<compile_context>
chip_gen: v5e
topology: v5e:2x2
jax: 0.10.0
libtpu: 0.0.40
codegen_flags: <defaults>
</compile_context>

<pallas_src>
import jax
import jax.numpy as jnp
from jax.experimental import pallas as pl
from jax.experimental.pallas import tpu as pltpu


# ----------------------------------------------------------------------------
# One-time parameter preparation (hoisted out of the per-forward hot path).
# ----------------------------------------------------------------------------
def _banded_conv_weights(w_hwio, width):
    """(3, 3, Cin, Cout) HWIO -> (3, width*Cin, width*Cout) block-banded matrices.

    B[kh][p*Cin + ci, w*Cout + co] = w_hwio[kh, p - w + 1, ci, co]  (zero off-band),
    so   out[h, :] = sum_kh  x_row_window[h + kh, :] @ B[kh]
    reproduces a 3x3 convolution with zero-padding=1 along W.
    """
    dtype = w_hwio.dtype
    # kw=0 needs source column w-1 (superdiag), kw=1 same column, kw=2 column w+1.
    shift = [jnp.eye(width, k=1 - kw, dtype=dtype) for kw in range(3)]
    return jnp.stack([
        sum(jnp.kron(shift[kw], w_hwio[kh, kw]) for kw in range(3))
        for kh in range(3)
    ])


def prepare_basic_block_params(w1_oihw, s1, b1, w2_oihw, s2, b2, width):
    """Fold BN scale into conv weights and build the lane-dense banded matrices.

    Call ONCE per parameter set; the results are reused by every forward call.
    """
    f32 = jnp.float32
    w1_hwio = jnp.transpose(w1_oihw, (2, 3, 1, 0)).astype(f32) * s1.astype(f32)
    w2_hwio = jnp.transpose(w2_oihw, (2, 3, 1, 0)).astype(f32) * s2.astype(f32)
    bw1 = _banded_conv_weights(w1_hwio, width)            # (3, W*Cin, W*Cout)
    bw2 = _banded_conv_weights(w2_hwio, width)            # (3, W*Cout, W*Cout)
    bias1 = jnp.tile(b1.astype(f32), width).reshape(1, -1)  # (1, W*Cout)
    bias2 = jnp.tile(b2.astype(f32), width).reshape(1, -1)  # (1, W*Cout)
    return bw1, bias1, bw2, bias2


# ----------------------------------------------------------------------------
# Kernel
# ----------------------------------------------------------------------------
def basic_block_kernel(xp_ref, w1_ref, b1_ref, w2_ref, b2_ref, out_ref):
    # xp_ref : (NB, H+4, W*Cin)   lane-dense input, H-padded by 2 (W padding is folded
    #                             into the banded weights)
    # w1_ref : (3, W*Cin, W*Cout) block-banded conv1 weights (bn1 scale folded in)
    # b1_ref : (1, W*Cout)        bn1 bias tiled over W
    # w2_ref : (3, W*Cout, W*Cout) block-banded conv2 weights (bn2 scale folded in)
    # b2_ref : (1, W*Cout)        bn2 bias tiled over W
    # out_ref: (NB, H, W*Cout)
    H = out_ref.shape[1]
    He = H + 2                                   # conv1 output rows incl. 1-row halo

    def band_dot(x3, w2d):
        # (NB, R, K) @ (K, C) -> (NB, R, C): one MXU matmul with M = NB*R.
        return jax.lax.dot_general(
            x3, w2d, dimension_numbers=(((2,), (0,)), ((), ())),
            preferred_element_type=jnp.float32)

    # ---- conv1 (+ folded bn1 scale): 3 banded MXU matmuls over H-shifted row windows.
    #      Taps are loaded as ref-level shifted windows (cheap vld streams, no
    #      sublane-shift relayout).  Extended to H+2 output rows so the result is
    #      already "H-padded" for conv2 (no scratch / store-reload round trip).
    h1e = band_dot(xp_ref[:, 0:He, :], w1_ref[0])
    h1e = h1e + band_dot(xp_ref[:, 1:1 + He, :], w1_ref[1])
    h1e = h1e + band_dot(xp_ref[:, 2:2 + He, :], w1_ref[2])
    h1e = jnp.maximum(h1e + b1_ref[...], 0.0)    # bn1 bias + relu   (NB, He, W*Cout)

    # Zero the 1-row halo (those rows came from padding-only windows) so h1e doubles
    # as the H-padded conv2 input.
    row = jax.lax.broadcasted_iota(jnp.int32, h1e.shape, 1)
    h1p = jnp.where((row == 0) | (row == He - 1), 0.0, h1e)

    # ---- conv2 (+ folded bn2 scale) ----
    o = band_dot(h1p[:, 0:H, :], w2_ref[0])
    o = o + band_dot(h1p[:, 1:1 + H, :], w2_ref[1])
    o = o + band_dot(h1p[:, 2:2 + H, :], w2_ref[2])

    # ---- bn2 bias + residual add + relu (identity read from the resident input) ----
    identity = xp_ref[:, 2:2 + H, :]
    out_ref[...] = jnp.maximum(o + b2_ref[...] + identity, 0.0).astype(out_ref.dtype)


# ----------------------------------------------------------------------------
# Wrapper
# ----------------------------------------------------------------------------
def _tensorcores_per_chip():
    try:
        kind = jax.devices()[0].device_kind.lower()
    except Exception:
        return 1
    # v7x (and v4 / v5p megacore-style chips) expose 2 TensorCores per chip;
    # v5e / v6e have 1.
    return 2 if any(t in kind for t in ("v7", "v4", "v5p")) else 1


def basic_block_forward(x_nchw, params):
    """Fused BasicBlock forward.  x_nchw: (N, C, H, W) f32; params from prepare_*."""
    bw1, bias1, bw2, bias2 = params
    N, Cin, H, W = x_nchw.shape
    WCi = W * Cin
    WCo = bias1.shape[-1]
    Cout = WCo // W
    assert Cout == Cin, "stride=1 / no-downsample BasicBlock requires planes == inplanes"
    # Perf premise of the whole design: unmasked 128-lane-dense last dim.
    assert WCi % 128 == 0 and WCo % 128 == 0, (
        "W*C must be a multiple of 128 for the lane-dense layout")
    f32 = jnp.float32

    # --- layout plumbing: NCHW -> lane-dense (N, H, W*C), pad H by 2 ---
    x2d = jnp.transpose(x_nchw, (0, 2, 3, 1)).reshape(N, H, WCi).astype(f32)
    xpad = jnp.pad(x2d, ((0, 0), (2, 2), (0, 0)))

    # --- grid choice: 1 step with whole batch on single-TC chips (v5e/v6e);
    #     2 parallel steps of ceil(N/2) images each on dual-TC chips (v7x). ---
    tcs = _tensorcores_per_chip()
    n_steps = max(1, min(N, tcs))
    imgs = -(-N // n_steps)                      # images per grid step
    n_pad = n_steps * imgs
    if n_pad != N:
        xpad = jnp.pad(xpad, ((0, n_pad - N), (0, 0), (0, 0)))

    flops = 2 * 3 * n_pad * ((H + 2) * WCi * WCo + H * WCo * WCo)
    bytes_accessed = 4 * (n_pad * (H + 4) * WCi + n_pad * H * WCo
                          + 3 * WCi * WCo + 3 * WCo * WCo + 2 * WCo)

    out2d = pl.pallas_call(
        basic_block_kernel,
        out_shape=jax.ShapeDtypeStruct((n_pad, H, WCo), f32),
        grid_spec=pltpu.PrefetchScalarGridSpec(
            num_scalar_prefetch=0,
            grid=(n_steps,),
            in_specs=[
                pl.BlockSpec((imgs, H + 4, WCi), lambda n: (n, 0, 0)),
                # TODO(synk): at real ResNet sizes mark these grid-invariant operands
                #             pipeline_mode=pl.Buffered(1) and switch to compact tiled
                #             weights (the banded trick blows v7x's 64 MiB VMEM there).
                pl.BlockSpec((3, WCi, WCo), lambda n: (0, 0, 0)),
                pl.BlockSpec((1, WCo), lambda n: (0, 0)),
                pl.BlockSpec((3, WCo, WCo), lambda n: (0, 0, 0)),
                pl.BlockSpec((1, WCo), lambda n: (0, 0)),
            ],
            out_specs=pl.BlockSpec((imgs, H, WCo), lambda n: (n, 0, 0)),
        ),
        compiler_params=pltpu.CompilerParams(
            dimension_semantics=("parallel",)),
        cost_estimate=pl.CostEstimate(
            flops=flops, transcendentals=0, bytes_accessed=bytes_accessed),
    )(xpad, bw1, bias1, bw2, bias2)

    out_nhwc = out2d[:N].reshape(N, H, W, Cout)
    return jnp.transpose(out_nhwc, (0, 3, 1, 2))      # back to NCHW


# ----------------------------------------------------------------------------
# Pure-JAX reference (NCHW) for correctness checking.
# ----------------------------------------------------------------------------
def reference_forward(x_nchw, w1, s1, b1, w2, s2, b2):
    def conv(x, w):
        return jax.lax.conv_general_dilated(
            x, w, window_strides=(1, 1), padding=[(1, 1), (1, 1)],
            dimension_numbers=("NCHW", "OIHW", "NCHW"))
    h = conv(x_nchw, w1)
    h = h * s1[None, :, None, None] + b1[None, :, None, None]
    h = jnp.maximum(h, 0.0)
    h = conv(h, w2)
    h = h * s2[None, :, None, None] + b2[None, :, None, None]
    return jnp.maximum(h + x_nchw, 0.0)


if __name__ == "__main__":
    # BasicBlock(inplanes=8, planes=8, stride=1); W*C = 16*8 = 128 -> lane-dense slabs.
    N, C, H, W = 2, 8, 16, 16
    key = jax.random.PRNGKey(0)
    k = jax.random.split(key, 10)

    x = jax.random.normal(k[0], (N, C, H, W), jnp.float32)

    # conv weights (OIHW), bias=False
    w1 = jax.random.normal(k[1], (C, C, 3, 3), jnp.float32) * 0.1
    w2 = jax.random.normal(k[2], (C, C, 3, 3), jnp.float32) * 0.1

    # BatchNorm2d (eval mode) parameters, folded to per-channel scale/bias
    eps = 1e-5
    g1 = 1.0 + 0.1 * jax.random.normal(k[3], (C,), jnp.float32)
    beta1 = 0.1 * jax.random.normal(k[4], (C,), jnp.float32)
    mean1 = 0.1 * jax.random.normal(k[5], (C,), jnp.float32)
    var1 = jnp.abs(jax.random.normal(k[6], (C,), jnp.float32)) + 0.5
    g2 = 1.0 + 0.1 * jax.random.normal(k[7], (C,), jnp.float32)
    beta2 = 0.1 * jax.random.normal(k[8], (C,), jnp.float32)
    mean2 = 0.1 * jax.random.normal(k[9], (C,), jnp.float32)
    var2 = jnp.ones((C,), jnp.float32)

    s1 = g1 / jnp.sqrt(var1 + eps)
    b1 = beta1 - mean1 * s1
    s2 = g2 / jnp.sqrt(var2 + eps)
    b2 = beta2 - mean2 * s2

    # One-time parameter prep (off the per-forward hot path).
    params = prepare_basic_block_params(w1, s1, b1, w2, s2, b2, W)
    params = jax.block_until_ready(params)

    fwd = jax.jit(basic_block_forward)
    out = jax.block_until_ready(fwd(x, params))

    ref = reference_forward(x, w1, s1, b1, w2, s2, b2)
    assert out.shape == (N, C, H, W)
    assert jnp.allclose(out, ref, atol=1e-4, rtol=1e-4), "mismatch vs reference"

    print("KERNEL_OK")
</pallas_src>

<mosaic_0001>
module attributes {stable_mosaic.version = 11 : i64} {
  func.func @basic_block_kernel(%arg0: i32, %arg1: memref<2x20x128xf32, #tpu.memory_space<vmem>>, %arg2: memref<3x128x128xf32, #tpu.memory_space<vmem>>, %arg3: memref<1x128xf32, #tpu.memory_space<vmem>>, %arg4: memref<3x128x128xf32, #tpu.memory_space<vmem>>, %arg5: memref<1x128xf32, #tpu.memory_space<vmem>>, %arg6: memref<2x16x128xf32, #tpu.memory_space<vmem>>) attributes {dimension_semantics = [#tpu.dimension_semantics<parallel>], iteration_bounds = array<i64: 1>, scalar_prefetch = 0 : i64, scratch_operands = 0 : i64, tpu.core_type = #tpu.core_type<tc>, window_params = [{transform_indices = @transform_0, window_bounds = array<i64: 2, 20, 128>}, {pipeline_mode = #tpu.pipeline_mode<synchronous>, transform_indices = @transform_1, window_bounds = array<i64: 3, 128, 128>}, {pipeline_mode = #tpu.pipeline_mode<synchronous>, transform_indices = @transform_2, window_bounds = array<i64: 1, 128>}, {pipeline_mode = #tpu.pipeline_mode<synchronous>, transform_indices = @transform_3, window_bounds = array<i64: 3, 128, 128>}, {pipeline_mode = #tpu.pipeline_mode<synchronous>, transform_indices = @transform_4, window_bounds = array<i64: 1, 128>}, {transform_indices = @transform_5, window_bounds = array<i64: 2, 16, 128>}]} {
    %c0 = arith.constant 0 : index
    %c0_0 = arith.constant 0 : index
    %c0_1 = arith.constant 0 : index
    %0 = vector.load %arg1[%c0, %c0_0, %c0_1] : memref<2x20x128xf32, #tpu.memory_space<vmem>>, vector<2x18x128xf32>
    %c0_2 = arith.constant 0 : index
    %c0_3 = arith.constant 0 : index
    %c0_4 = arith.constant 0 : index
    %1 = vector.load %arg2[%c0_2, %c0_3, %c0_4] : memref<3x128x128xf32, #tpu.memory_space<vmem>>, vector<1x128x128xf32>
    %2 = vector.shape_cast %1 : vector<1x128x128xf32> to vector<128x128xf32>
    %cst = arith.constant dense<0.000000e+00> : vector<2x18x128xf32>
    %3 = tpu.matmul %0, %2, %cst {dimension_numbers = #tpu.dot_dimension_numbers<[2], [0], [0, 1], [1], [0, 0, 0, 1, 1, 1], [], []>} : vector<2x18x128xf32>, vector<128x128xf32>, vector<2x18x128xf32> -> vector<2x18x128xf32>
    %c0_5 = arith.constant 0 : index
    %c1 = arith.constant 1 : index
    %c0_6 = arith.constant 0 : index
    %4 = vector.load %arg1[%c0_5, %c1, %c0_6] : memref<2x20x128xf32, #tpu.memory_space<vmem>>, vector<2x18x128xf32>
    %c1_7 = arith.constant 1 : index
    %c0_8 = arith.constant 0 : index
    %c0_9 = arith.constant 0 : index
    %5 = vector.load %arg2[%c1_7, %c0_8, %c0_9] : memref<3x128x128xf32, #tpu.memory_space<vmem>>, vector<1x128x128xf32>
    %6 = vector.shape_cast %5 : vector<1x128x128xf32> to vector<128x128xf32>
    %cst_10 = arith.constant dense<0.000000e+00> : vector<2x18x128xf32>
    %7 = tpu.matmul %4, %6, %cst_10 {dimension_numbers = #tpu.dot_dimension_numbers<[2], [0], [0, 1], [1], [0, 0, 0, 1, 1, 1], [], []>} : vector<2x18x128xf32>, vector<128x128xf32>, vector<2x18x128xf32> -> vector<2x18x128xf32>
    %8 = arith.addf %3, %7 : vector<2x18x128xf32>
    %c0_11 = arith.constant 0 : index
    %c2 = arith.constant 2 : index
    %c0_12 = arith.constant 0 : index
    %9 = vector.load %arg1[%c0_11, %c2, %c0_12] : memref<2x20x128xf32, #tpu.memory_space<vmem>>, vector<2x18x128xf32>
    %c2_13 = arith.constant 2 : index
    %c0_14 = arith.constant 0 : index
    %c0_15 = arith.constant 0 : index
    %10 = vector.load %arg2[%c2_13, %c0_14, %c0_15] : memref<3x128x128xf32, #tpu.memory_space<vmem>>, vector<1x128x128xf32>
    %11 = vector.shape_cast %10 : vector<1x128x128xf32> to vector<128x128xf32>
    %cst_16 = arith.constant dense<0.000000e+00> : vector<2x18x128xf32>
    %12 = tpu.matmul %9, %11, %cst_16 {dimension_numbers = #tpu.dot_dimension_numbers<[2], [0], [0, 1], [1], [0, 0, 0, 1, 1, 1], [], []>} : vector<2x18x128xf32>, vector<128x128xf32>, vector<2x18x128xf32> -> vector<2x18x128xf32>
    %13 = arith.addf %8, %12 : vector<2x18x128xf32>
    %c0_17 = arith.constant 0 : index
    %c0_18 = arith.constant 0 : index
    %14 = vector.load %arg3[%c0_17, %c0_18] : memref<1x128xf32, #tpu.memory_space<vmem>>, vector<1x128xf32>
    %15 = vector.shape_cast %14 : vector<1x128xf32> to vector<1x1x128xf32>
    %16 = vector.broadcast %15 : vector<1x1x128xf32> to vector<2x18x128xf32>
    %17 = arith.addf %13, %16 : vector<2x18x128xf32>
    %cst_19 = arith.constant 0.000000e+00 : f32
    %18 = vector.broadcast %cst_19 : f32 to vector<2x18x128xf32>
    %19 = arith.maximumf %17, %18 : vector<2x18x128xf32>
    %20 = tpu.iota {dimensions = array<i32: 1>} : vector<2x18x128xi32>
    %c0_i32 = arith.constant 0 : i32
    %21 = vector.broadcast %c0_i32 : i32 to vector<2x18x128xi32>
    %22 = arith.cmpi eq, %20, %21 : vector<2x18x128xi32>
    %c17_i32 = arith.constant 17 : i32
    %23 = vector.broadcast %c17_i32 : i32 to vector<2x18x128xi32>
    %24 = arith.cmpi eq, %20, %23 : vector<2x18x128xi32>
    %25 = arith.ori %22, %24 : vector<2x18x128xi1>
    %cst_20 = arith.constant 0.000000e+00 : f32
    %26 = vector.broadcast %cst_20 : f32 to vector<2x18x128xf32>
    %27 = arith.select %25, %26, %19 : vector<2x18x128xi1>, vector<2x18x128xf32>
    %28 = vector.extract_strided_slice %27 {offsets = [0, 0, 0], sizes = [2, 16, 128], strides = [1, 1, 1]} : vector<2x18x128xf32> to vector<2x16x128xf32>
    %c0_21 = arith.constant 0 : index
    %c0_22 = arith.constant 0 : index
    %c0_23 = arith.constant 0 : index
    %29 = vector.load %arg4[%c0_21, %c0_22, %c0_23] : memref<3x128x128xf32, #tpu.memory_space<vmem>>, vector<1x128x128xf32>
    %30 = vector.shape_cast %29 : vector<1x128x128xf32> to vector<128x128xf32>
    %cst_24 = arith.constant dense<0.000000e+00> : vector<2x16x128xf32>
    %31 = tpu.matmul %28, %30, %cst_24 {dimension_numbers = #tpu.dot_dimension_numbers<[2], [0], [0, 1], [1], [0, 0, 0, 1, 1, 1], [], []>} : vector<2x16x128xf32>, vector<128x128xf32>, vector<2x16x128xf32> -> vector<2x16x128xf32>
    %32 = vector.extract_strided_slice %27 {offsets = [0, 1, 0], sizes = [2, 16, 128], strides = [1, 1, 1]} : vector<2x18x128xf32> to vector<2x16x128xf32>
    %c1_25 = arith.constant 1 : index
    %c0_26 = arith.constant 0 : index
    %c0_27 = arith.constant 0 : index
    %33 = vector.load %arg4[%c1_25, %c0_26, %c0_27] : memref<3x128x128xf32, #tpu.memory_space<vmem>>, vector<1x128x128xf32>
    %34 = vector.shape_cast %33 : vector<1x128x128xf32> to vector<128x128xf32>
    %cst_28 = arith.constant dense<0.000000e+00> : vector<2x16x128xf32>
    %35 = tpu.matmul %32, %34, %cst_28 {dimension_numbers = #tpu.dot_dimension_numbers<[2], [0], [0, 1], [1], [0, 0, 0, 1, 1, 1], [], []>} : vector<2x16x128xf32>, vector<128x128xf32>, vector<2x16x128xf32> -> vector<2x16x128xf32>
    %36 = arith.addf %31, %35 : vector<2x16x128xf32>
    %37 = vector.extract_strided_slice %27 {offsets = [0, 2, 0], sizes = [2, 16, 128], strides = [1, 1, 1]} : vector<2x18x128xf32> to vector<2x16x128xf32>
    %c2_29 = arith.constant 2 : index
    %c0_30 = arith.constant 0 : index
    %c0_31 = arith.constant 0 : index
    %38 = vector.load %arg4[%c2_29, %c0_30, %c0_31] : memref<3x128x128xf32, #tpu.memory_space<vmem>>, vector<1x128x128xf32>
    %39 = vector.shape_cast %38 : vector<1x128x128xf32> to vector<128x128xf32>
    %cst_32 = arith.constant dense<0.000000e+00> : vector<2x16x128xf32>
    %40 = tpu.matmul %37, %39, %cst_32 {dimension_numbers = #tpu.dot_dimension_numbers<[2], [0], [0, 1], [1], [0, 0, 0, 1, 1, 1], [], []>} : vector<2x16x128xf32>, vector<128x128xf32>, vector<2x16x128xf32> -> vector<2x16x128xf32>
    %41 = arith.addf %36, %40 : vector<2x16x128xf32>
    %c0_33 = arith.constant 0 : index
    %c2_34 = arith.constant 2 : index
    %c0_35 = arith.constant 0 : index
    %42 = vector.load %arg1[%c0_33, %c2_34, %c0_35] : memref<2x20x128xf32, #tpu.memory_space<vmem>>, vector<2x16x128xf32>
    %c0_36 = arith.constant 0 : index
    %c0_37 = arith.constant 0 : index
    %43 = vector.load %arg5[%c0_36, %c0_37] : memref<1x128xf32, #tpu.memory_space<vmem>>, vector<1x128xf32>
    %44 = vector.shape_cast %43 : vector<1x128xf32> to vector<1x1x128xf32>
    %45 = vector.broadcast %44 : vector<1x1x128xf32> to vector<2x16x128xf32>
    %46 = arith.addf %41, %45 : vector<2x16x128xf32>
    %47 = arith.addf %46, %42 : vector<2x16x128xf32>
    %cst_38 = arith.constant 0.000000e+00 : f32
    %48 = vector.broadcast %cst_38 : f32 to vector<2x16x128xf32>
    %49 = arith.maximumf %47, %48 : vector<2x16x128xf32>
    %c0_39 = arith.constant 0 : index
    %c0_40 = arith.constant 0 : index
    %c0_41 = arith.constant 0 : index
    %50 = vector.load %arg6[%c0_39, %c0_40, %c0_41] : memref<2x16x128xf32, #tpu.memory_space<vmem>>, vector<2x16x128xf32>
    tpu.vector_store %arg6[%c0_39, %c0_40, %c0_41], %49 {strides = array<i32>} : memref<2x16x128xf32, #tpu.memory_space<vmem>>, vector<2x16x128xf32>,
    return
  }
  func.func @transform_0(%arg0: i32) -> (i32, i32, i32) {
    %c0_i32 = arith.constant 0 : i32
    %c0_i32_0 = arith.constant 0 : i32
    %c0_i32_1 = arith.constant 0 : i32
    return %arg0, %c0_i32, %c0_i32_0 : i32, i32, i32
  }
  func.func @transform_1(%arg0: i32) -> (i32, i32, i32) {
    %c0_i32 = arith.constant 0 : i32
    %c0_i32_0 = arith.constant 0 : i32
    %c0_i32_1 = arith.constant 0 : i32
    %c0_i32_2 = arith.constant 0 : i32
    return %c0_i32, %c0_i32_0, %c0_i32_1 : i32, i32, i32
  }
  func.func @transform_2(%arg0: i32) -> (i32, i32) {
    %c0_i32 = arith.constant 0 : i32
    %c0_i32_0 = arith.constant 0 : i32
    %c0_i32_1 = arith.constant 0 : i32
    return %c0_i32, %c0_i32_0 : i32, i32
  }
  func.func @transform_3(%arg0: i32) -> (i32, i32, i32) {
    %c0_i32 = arith.constant 0 : i32
    %c0_i32_0 = arith.constant 0 : i32
    %c0_i32_1 = arith.constant 0 : i32
    %c0_i32_2 = arith.constant 0 : i32
    return %c0_i32, %c0_i32_0, %c0_i32_1 : i32, i32, i32
  }
  func.func @transform_4(%arg0: i32) -> (i32, i32) {
    %c0_i32 = arith.constant 0 : i32
    %c0_i32_0 = arith.constant 0 : i32
    %c0_i32_1 = arith.constant 0 : i32
    return %c0_i32, %c0_i32_0 : i32, i32
  }
  func.func @transform_5(%arg0: i32) -> (i32, i32, i32) {
    %c0_i32 = arith.constant 0 : i32
    %c0_i32_0 = arith.constant 0 : i32
    %c0_i32_1 = arith.constant 0 : i32
    return %arg0, %c0_i32, %c0_i32_0 : i32, i32, i32
  }
}

</mosaic_0001>

<bundles_post_ra>
// kernel: basic_block_forward.1
= control target key start
LH: loop header
LB: loop body
LE: loop exit
PB: predicated region body
PF: predicated region fallthrough
CT: control target
= control target key end

     0   :  { %vm582_vm2 = vcmask 1046528   ;;  %vm672_vm3 = vcmask 1045504   ;;  %s1408_s1 = inlined_call_operand.vmem [shape: f32[3,128,128], index: 1, kind: input, shape index: {}]   ;;  %s1409_s0 = inlined_call_operand.vmem [shape: f32[2,20,128], index: 0, kind: input, shape index: {}]   ;;  %s1410_s2 = inlined_call_operand.vmem [shape: f32[1,128], index: 2, kind: input, shape index: {}]   ;;  %s1411_s3 = inlined_call_operand.vmem [shape: f32[3,128,128], index: 3, kind: input, shape index: {}]   ;;  %s1412_s4 = inlined_call_operand.vmem [shape: f32[1,128], index: 4, kind: input, shape index: {}]   ;;  %s1413_s5 = inlined_call_operand.vmem [shape: f32[2,16,128], index: 5, kind: output, shape index: {}]  }
   0x1   :  { %v779_v0 = vld [vmem:[%s1408_s1 + $0x178] sm:$0xff]  ;;  %v778_v1 = vld [vmem:[%s1408_s1 + $0x170] sm:$0xff]  ;;  %v777_v5 = vld [vmem:[%s1408_s1 + $0x168] sm:$0xff] }
   0x2   :  { %v763_v2 = vld [vmem:[%s1408_s1 + $0xf8] sm:$0xff]  ;;  %342 = vmatpush.msra.mxu2 %v779_v0  ;;  %v762_v4 = vld [vmem:[%s1408_s1 + $0xf0] sm:$0xff]  ;;  %v761_v7 = vld [vmem:[%s1408_s1 + $0xe8] sm:$0xff] }
   0x3   :  { %118 = vmatpush.msra.mxu0 %v763_v2  ;;  %v41_v3 = vld [vmem:[%s1408_s1 + $0x78] sm:$0xff]  ;;  %v40_v6 = vld [vmem:[%s1408_s1 + $0x70] sm:$0xff]  ;;  %v39_v8 = vld [vmem:[%s1408_s1 + $0x68] sm:$0xff] }
   0x4   :  { %203 = vmatpush.msra.mxu1 %v41_v3  ;;  %343 = vmatpush.msra.mxu2 %v778_v1  ;;  %v776_v9 = vld [vmem:[%s1408_s1 + $0x160] sm:$0xff]  ;;  %v775_v12 = vld [vmem:[%s1408_s1 + $0x158] sm:$0xff]  ;;  %v774_v15 = vld [vmem:[%s1408_s1 + $0x150] sm:$0xff] }
   0x5   :  { %119 = vmatpush.msra.mxu0 %v762_v4  ;;  %v760_v10 = vld [vmem:[%s1408_s1 + $0xe0] sm:$0xff]  ;;  %v759_v13 = vld [vmem:[%s1408_s1 + $0xd8] sm:$0xff]  ;;  %v758_v16 = vld [vmem:[%s1408_s1 + $0xd0] sm:$0xff] }
   0x6   :  { %204 = vmatpush.msra.mxu1 %v40_v6  ;;  %344 = vmatpush.msra.mxu2 %v777_v5  ;;  %v38_v11 = vld [vmem:[%s1408_s1 + $0x60] sm:$0xff]  ;;  %v37_v14 = vld [vmem:[%s1408_s1 + $0x58] sm:$0xff]  ;;  %v36_v17 = vld [vmem:[%s1408_s1 + $0x50] sm:$0xff] }
   0x7   :  { %120 = vmatpush.msra.mxu0 %v761_v7  ;;  %v773_v18 = vld [vmem:[%s1408_s1 + $0x148] sm:$0xff]  ;;  %v772_v21 = vld [vmem:[%s1408_s1 + $0x140] sm:$0xff]  ;;  %v771_v24 = vld [vmem:[%s1408_s1 + $0x138] sm:$0xff] }
   0x8   :  { %205 = vmatpush.msra.mxu1 %v39_v8  ;;  %345 = vmatpush.msra.mxu2 %v776_v9  ;;  %v757_v19 = vld [vmem:[%s1408_s1 + $0xc8] sm:$0xff]  ;;  %v756_v22 = vld [vmem:[%s1408_s1 + $0xc0] sm:$0xff]  ;;  %v755_v25 = vld [vmem:[%s1408_s1 + $0xb8] sm:$0xff] }
   0x9   :  { %121 = vmatpush.msra.mxu0 %v760_v10  ;;  %v35_v20 = vld [vmem:[%s1408_s1 + $0x48] sm:$0xff]  ;;  %v34_v23 = vld [vmem:[%s1408_s1 + $0x40] sm:$0xff]  ;;  %v33_v26 = vld [vmem:[%s1408_s1 + $0x38] sm:$0xff] }
   0xa   :  { %206 = vmatpush.msra.mxu1 %v38_v11  ;;  %346 = vmatpush.msra.mxu2 %v775_v12  ;;  %v770_v27 = vld [vmem:[%s1408_s1 + $0x130] sm:$0xff]  ;;  %v42_v29 = vld [vmem:[%s1409_s0 + $0x1] sm:$0xff]  ;;  %v767_v40 = vld [vmem:[%s1408_s1 + $0x118] sm:$0xff] }
   0xb   :  { %122 = vmatpush.msra.mxu0 %v759_v13  ;;  %v754_v28 = vld [vmem:[%s1408_s1 + $0xb0] sm:$0xff]  ;;  %v71_v31 = vrot.slane %v42_v29, 2  ;;  %v72_v32 = vrot.slane %v42_v29, 4  ;;  %v769_v33 = vld [vmem:[%s1408_s1 + $0x128] sm:$0xff]  ;;  %v73_v35 = vrot.slane %v42_v29, 6  ;;  %v768_v37 = vld [vmem:[%s1408_s1 + $0x120] sm:$0xff] }
   0xc   :  { %207 = vmatpush.msra.mxu1 %v37_v14  ;;  %347 = vmatpush.msra.mxu2 %v774_v15  ;;  %v32_v30 = vld [vmem:[%s1408_s1 + $0x30] sm:$0xff]  ;;  %v753_v34 = vld [vmem:[%s1408_s1 + $0xa8] sm:$0xff]  ;;  %83 = vst [vmem:[#allocation1] ss:$4 sm:$0xff] %v42_v29  ;;  %v752_v38 = vld [vmem:[%s1408_s1 + $0xa0] sm:$0xff] }
   0xd   :  { %123 = vmatpush.msra.mxu0 %v758_v16  ;;  %v31_v36 = vld [vmem:[%s1408_s1 + $0x28] sm:$0xff]  ;;  %85 = vst [vmem:[#allocation1 + $0x1] ss:$4 sm:$0xff] %v71_v31  ;;  %v30_v39 = vld [vmem:[%s1408_s1 + $0x20] sm:$0xff]  ;;  %v751_v41 = vld [vmem:[%s1408_s1 + $0x98] sm:$0xff] }
   0xe   :  { %208 = vmatpush.msra.mxu1 %v36_v17  ;;  %348 = vmatpush.msra.mxu2 %v773_v18  ;;  %87 = vst [vmem:[#allocation1 + $0x2] ss:$4 sm:$0xff] %v72_v32  ;;  %v766_v42 = vld [vmem:[%s1408_s1 + $0x110] sm:$0xff]  ;;  %v29_v43 = vld [vmem:[%s1408_s1 + $0x18] sm:$0xff]  ;;  %v765_v50 = vld [vmem:[%s1408_s1 + $0x108] sm:$0xff] }
   0xf   :  { %124 = vmatpush.msra.mxu0 %v757_v19  ;;  %89 = vst [vmem:[#allocation1 + $0x3] ss:$4 sm:$0xff] %v73_v35  ;;  %v750_v44 = vld [vmem:[%s1408_s1 + $0x90] sm:$0xff]  ;;  %v45_v45 = vld [vmem:[%s1409_s0 + $0x19] sm:$0xff]  ;;  %v46_v57 = vld [vmem:[%s1409_s0 + $0x21] sm:$0xff] }
  0x10   :  { %209 = vmatpush.msra.mxu1 %v35_v20  ;;  %349 = vmatpush.msra.mxu2 %v772_v21  ;;  %v43_v46 = vld [vmem:[%s1409_s0 + $0x9] sm:$0xff]  ;;  %v44_v51 = vld [vmem:[%s1409_s0 + $0x11] sm:$0x3]  ;;  %v764_v52 = vld [vmem:[%s1408_s1 + $0x100] sm:$0xff]  ;;  %v77_v53 = vrot.slane %v45_v45, 2  ;;  %v78_v54 = vrot.slane %v45_v45, 4 }
  0x11   :  { %125 = vmatpush.msra.mxu0 %v756_v22  ;;  %v28_v47 = vld [vmem:[%s1408_s1 + $0x10] sm:$0xff]  ;;  %v74_v48 = vrot.slane %v43_v46, 2  ;;  %v75_v49 = vrot.slane %v43_v46, 4  ;;  %91 = vst [vmem:[#allocation1 + $0x20] ss:$4 sm:$0xff] %v43_v46  ;;  %v76_v56 = vrot.slane %v43_v46, 6 }
  0x12   :  { %210 = vmatpush.msra.mxu1 %v34_v23  ;;  %350 = vmatpush.msra.mxu2 %v771_v24  ;;  %v82_v58 = vrot.slane %v46_v57, 6  ;;  %v47_v59 = vld [vmem:[%s1409_s0 + $0x29] sm:$0x3]  ;;  %v79_v60 = vrot.slane %v45_v45, 6  ;;  %v80_v62 = vrot.slane %v46_v57, 2  ;;  %v81_v0 = vrot.slane %v46_v57, 4 }
  0x13   :  { %126 = vmatpush.msra.mxu0 %v755_v25  ;;  %93 = vst [vmem:[#allocation1 + $0x21] ss:$4 sm:$0xff] %v74_v48  ;;  %v20_v1 = vld [vmem:[%s1409_s0] sm:$0xff]  ;;  %v21_v4 = vld [vmem:[%s1409_s0 + $0x8] sm:$0xff]  ;;  %v23_v11 = vld [vmem:[%s1409_s0 + $0x18] sm:$0xff] }
  0x14   :  { %211 = vmatpush.msra.mxu1 %v33_v26  ;;  %351 = vmatpush.msra.mxu2 %v770_v27  ;;  %95 = vst [vmem:[#allocation1 + $0x22] ss:$4 sm:$0xff] %v75_v49  ;;  %v156_v2 = vrot.slane %v20_v1, 2  ;;  %v157_v3 = vrot.slane %v20_v1, 4  ;;  %v158_v6 = vrot.slane %v20_v1, 6  ;;  %v159_v7 = vrot.slane %v21_v4, 2 }
  0x15   :  { %127 = vmatpush.msra.mxu0 %v754_v28  ;;  %97 = vst [vmem:[#allocation1 + $0x23] ss:$4 sm:$0xff] %v76_v56  ;;  %v160_v8 = vrot.slane %v21_v4, 4  ;;  %v161_v10 = vrot.slane %v21_v4, 6  ;;  %v22_v12 = vld [vmem:[%s1409_s0 + $0x10] sm:$0x3] }
  0x16   :  { %212 = vmatpush.msra.mxu1 %v32_v30  ;;  %352 = vmatpush.msra.mxu2 %v769_v33  ;;  %v98_v55 = vld.sshfl [vmem:[#allocation1] sm:$0xff pattern:$0x73625140]  ;;  %v162_v13 = vrot.slane %v23_v11, 2  ;;  %v163_v14 = vrot.slane %v23_v11, 4  ;;  %v749_v16 = vld [vmem:[%s1408_s1 + $0x88] sm:$0xff] }
  0x17   :  { %128 = vmatpush.msra.mxu0 %v753_v34  ;;  %100 = vst [vmem:[#allocation1] ss:$4 sm:$0xff] %v44_v51  ;;  %v27_v17 = vld [vmem:[%s1408_s1 + $0x8] sm:$0xff]  ;;  %v748_v18 = vld [vmem:[%s1408_s1 + $0x80] sm:$0xff]  ;;  %v164_v20 = vrot.slane %v23_v11, 6  ;;  %v1108_v48 = vld [vmem:[%s1411_s3 + $0x78] sm:$0xff] }
  0x18   :  { %213 = vmatpush.msra.mxu1 %v31_v36  ;;  %353 = vmatpush.msra.mxu2 %v768_v37  ;;  %101 = vst [vmem:[#allocation1 + $0x1] ss:$4 sm:$0xff] %v45_v45  ;;  %v26_v19 = vld [vmem:[%s1408_s1] sm:$0xff]  ;;  %v25_v26 = vld [vmem:[%s1409_s0 + $0x28] sm:$0x3]  ;;  %v1069_v27 = vld [vmem:[%s1409_s0 + $0xa] sm:$0xff] }
  0x19   :  { %129 = vmatpush.msra.mxu0 %v752_v38  ;;  %102 = vst [vmem:[#allocation1 + $0x2] ss:$4 sm:$0xff] %v77_v53  ;;  %v24_v21 = vld [vmem:[%s1409_s0 + $0x20] sm:$0xff]  ;;  %v298_v29 = vrot.slane %v1069_v27, 2  ;;  %v299_v30 = vrot.slane %v1069_v27, 4  ;;  %v300_v33 = vrot.slane %v1069_v27, 6 }
  0x1a   :  { %214 = vmatpush.msra.mxu1 %v30_v39  ;;  %354 = vmatpush.msra.mxu2 %v767_v40  ;;  %103 = vst [vmem:[#allocation1 + $0x3] ss:$4 sm:$0xff] %v78_v54  ;;  %v165_v22 = vrot.slane %v24_v21, 2  ;;  %v166_v23 = vrot.slane %v24_v21, 4  ;;  %v167_v25 = vrot.slane %v24_v21, 6  ;;  %v1076_v31 = vld [vmem:[%s1409_s0 + $0x2] sm:$0xff] }
  0x1b   :  { %130 = vmatpush.msra.mxu0 %v751_v41  ;;  %v295_v34 = vrot.slane %v1076_v31, 2  ;;  %v296_v35 = vrot.slane %v1076_v31, 4  ;;  %v297_v37 = vrot.slane %v1076_v31, 6  ;;  %v1088_v38 = vld [vmem:[%s1409_s0 + $0x1a] sm:$0xff]  ;;  %v1093_v39 = vld [vmem:[%s1409_s0 + $0x22] sm:$0xff]  ;;  %v1113_v49 = vld [vmem:[%s1411_s3 + $0x70] sm:$0xff] }
  0x1c   :  { %215 = vmatpush.msra.mxu1 %v29_v43  ;;  %355 = vmatpush.msra.mxu2 %v766_v42  ;;  %v99_v63 = vld.sshfl [vmem:[#allocation1 + $0x20] sm:$0xff pattern:$0x73625140]  ;;  %v303_v40 = vrot.slane %v1088_v38, 6  ;;  %v304_v41 = vrot.slane %v1093_v39, 2  ;;  %v305_v43 = vrot.slane %v1093_v39, 4 }
  0x1d   :  { %131 = vmatpush.msra.mxu0 %v750_v44  ;;  %104 = vst [vmem:[#allocation1 + $0x20] ss:$4 sm:$0xff] %v79_v60  ;;  %v268_v44 = vld [vmem:[%s1409_s0 + $0x12] sm:$0x3]  ;;  %v301_v45 = vrot.slane %v1088_v38, 2  ;;  %v795_v51 = vld [vmem:[%s1411_s3 + $0xf8] sm:$0xff] }
  0x1e   :  { %216 = vmatpush.msra.mxu1 %v28_v47  ;;  %356 = vmatpush.msra.mxu2 %v765_v50  ;;  %105 = vst [vmem:[#allocation1 + $0x21] ss:$4 sm:$0xff] %v46_v57  ;;  %v302_v47 = vrot.slane %v1088_v38, 4  ;;  %v1120_v50 = vld [vmem:[%s1411_s3 + $0x68] sm:$0xff]  ;;  %v1133_v53 = vld [vmem:[%s1411_s3 + $0x60] sm:$0xff]  ;;  %v1139_v54 = vld [vmem:[%s1411_s3 + $0x58] sm:$0xff] }
  0x1f   :  { %106 = vst [vmem:[#allocation1 + $0x22] ss:$4 sm:$0xff] %v80_v62  ;;  %132 = vmatpush.msra.mxu0 %v749_v16  ;;  %597 = vmatpush.msra.mxu3 %v795_v51  ;;  %v1146_v56 = vld [vmem:[%s1411_s3 + $0x50] sm:$0xff]  ;;  %v271_v57 = vld [vmem:[%s1409_s0 + $0x2a] sm:$0x3]  ;;  %v788_v16 = vld [vmem:[%s1411_s3 + $0xc0] sm:$0xff] }
  0x20   :  { %357 = vmatpush.msra.mxu2 %v764_v52  ;;  %107 = vst [vmem:[#allocation1 + $0x23] ss:$4 sm:$0xff] %v81_v0  ;;  %217 = vmatpush.msra.mxu1 %v27_v17  ;;  %v815_v52 = vld [vmem:[%s1411_s3 + $0x178] sm:$0xff]  ;;  %v794_v62 = vld [vmem:[%s1411_s3 + $0xf0] sm:$0xff]  ;;  %v1168_v0 = vld [vmem:[%s1411_s3 + $0x40] sm:$0xff] }
  0x21   :  { %v1030_v61 = vld.sshfl [vmem:[#allocation1] sm:$0xff pattern:$0x73625140]  ;;  %133 = vmatpush.msra.mxu0 %v748_v18  ;;  %598 = vmatpush.msra.mxu3 %v794_v62  ;;  %v1240_v18 = vld [vmem:[%s1411_s3 + $0x10] sm:$0xff] }
  0x22   :  { %110 = vst [vmem:[#allocation1] ss:$4 sm:$0xff] %v82_v58  ;;  %218 = vmatpush.msra.mxu1 %v26_v19  ;;  %134 = vmatmul.f32.vlgmr.msra.gmra.mxu0 %v98_v55  ;;  %v306_v55 = vrot.slane %v1093_v39, 6  ;;  %v808_v17 = vld [vmem:[%s1411_s3 + $0x140] sm:$0xff]  ;;  %v787_v19 = vld [vmem:[%s1411_s3 + $0xb8] sm:$0xff] }
  0x23   :  { %111 = vst [vmem:[#allocation1 + $0x1] ss:$4 sm:$0xff] %v47_v59  ;;  %626 = vmatpush.msrb.mxu2 %v1108_v48  ;;  %687 = vmatpush.msrb.mxu0 %v815_v52 }
  0x24   :  { %832 = vmatpush.msrb.mxu1 %v815_v52 }
  0x25   :  { %627 = vmatpush.msrb.mxu2 %v1113_v49 }
  0x27   :  { %v1040_v9 = vld.sshfl [vmem:[#allocation1 + $0x20] sm:$0xff pattern:$0x73625140]  ;;  %628 = vmatpush.msrb.mxu2 %v1120_v50 }
  0x28   :  { %176 = vst [vmem:[#allocation1 + $0x20] ss:$4 sm:$0xff] %v21_v4  ;;  %v792_v4 = vld [vmem:[%s1411_s3 + $0xe0] sm:$0xff] }
  0x29   :  { %178 = vst [vmem:[#allocation1 + $0x21] ss:$4 sm:$0xff] %v159_v7  ;;  %629 = vmatpush.msrb.mxu2 %v1133_v53  ;;  %v791_v7 = vld [vmem:[%s1411_s3 + $0xd8] sm:$0xff] }
  0x2a   :  { %v1038_v5 = vld.sshfl [vmem:[#allocation1] sm:$0xff pattern:$0x73625140]  ;;  %180 = vst [vmem:[#allocation1 + $0x22] ss:$4 sm:$0xff] %v160_v8  ;;  %137 = vmatmul.f32.gmra.mxu0 %v99_v63  ;;  %v814_v63 = vld [vmem:[%s1411_s3 + $0x170] sm:$0xff] }
  0x2b   :  { %168 = vst [vmem:[#allocation1] ss:$4 sm:$0xff] %v20_v1  ;;  %630 = vmatpush.msrb.mxu2 %v1139_v54  ;;  %688 = vmatpush.msrb.mxu0 %v814_v63  ;;  %v793_v1 = vld [vmem:[%s1411_s3 + $0xe8] sm:$0xff]  ;;  %v811_v8 = vld [vmem:[%s1411_s3 + $0x158] sm:$0xff] }
  0x2c   :  { %170 = vst [vmem:[#allocation1 + $0x1] ss:$4 sm:$0xff] %v156_v2  ;;  %833 = vmatpush.msrb.mxu1 %v814_v63  ;;  %v813_v2 = vld [vmem:[%s1411_s3 + $0x168] sm:$0xff]  ;;  %599 = vmatpush.msra.mxu3 %v793_v1 }
  0x2d   :  { %172 = vst [vmem:[#allocation1 + $0x2] ss:$4 sm:$0xff] %v157_v3  ;;  %631 = vmatpush.msrb.mxu2 %v1146_v56  ;;  %689 = vmatpush.msrb.mxu0 %v813_v2  ;;  %v1180_v3 = vld [vmem:[%s1411_s3 + $0x38] sm:$0xff] }
  0x2e   :  { %174 = vst [vmem:[#allocation1 + $0x3] ss:$4 sm:$0xff] %v158_v6  ;;  %834 = vmatpush.msrb.mxu1 %v813_v2  ;;  %600 = vmatpush.msra.mxu3 %v792_v4  ;;  %v1192_v6 = vld [vmem:[%s1411_s3 + $0x30] sm:$0xff] }
  0x2f   :  { %182 = vst [vmem:[#allocation1 + $0x23] ss:$4 sm:$0xff] %v161_v10  ;;  %v790_v10 = vld [vmem:[%s1411_s3 + $0xd0] sm:$0xff] }
  0x30   :  { %601 = vmatpush.msra.mxu3 %v791_v7 }
  0x32   :  { %140 = vmatmul.f32.gmra.mxu0 %v1030_v61  ;;  %v1156_v61 = vld [vmem:[%s1411_s3 + $0x48] sm:$0xff]  ;;  %602 = vmatpush.msra.mxu3 %v790_v10 }
  0x33   :  { %632 = vmatpush.msrb.mxu2 %v1156_v61 }
  0x35   :  { %v183_v15 = vld.sshfl [vmem:[#allocation1] sm:$0xff pattern:$0x73625140]  ;;  %633 = vmatpush.msrb.mxu2 %v1168_v0 }
  0x36   :  { %185 = vst [vmem:[#allocation1] ss:$4 sm:$0xff] %v22_v12  ;;  %219 = vmatmul.f32.vlgmr.msra.gmra.mxu1 %v183_v15  ;;  %v184_v24 = vld.sshfl [vmem:[#allocation1 + $0x20] sm:$0xff pattern:$0x73625140]  ;;  %v1228_v15 = vld [vmem:[%s1411_s3 + $0x18] sm:$0xff] }
  0x37   :  { %186 = vst [vmem:[#allocation1 + $0x1] ss:$4 sm:$0xff] %v23_v11  ;;  %634 = vmatpush.msrb.mxu2 %v1180_v3  ;;  %v810_v11 = vld [vmem:[%s1411_s3 + $0x150] sm:$0xff]  ;;  %v1216_v12 = vld [vmem:[%s1411_s3 + $0x20] sm:$0xff] }
  0x38   :  { %187 = vst [vmem:[#allocation1 + $0x2] ss:$4 sm:$0xff] %v162_v13  ;;  %v789_v13 = vld [vmem:[%s1411_s3 + $0xc8] sm:$0xff] }
  0x39   :  { %188 = vst [vmem:[#allocation1 + $0x3] ss:$4 sm:$0xff] %v163_v14  ;;  %635 = vmatpush.msrb.mxu2 %v1192_v6  ;;  %v809_v14 = vld [vmem:[%s1411_s3 + $0x148] sm:$0xff]  ;;  %603 = vmatpush.msra.mxu3 %v789_v13 }
  0x3a   :  { %189 = vst [vmem:[#allocation1 + $0x20] ss:$4 sm:$0xff] %v164_v20  ;;  %143 = vmatmul.f32.gmra.mxu0 %v1040_v9  ;;  %v1204_v9 = vld [vmem:[%s1411_s3 + $0x28] sm:$0xff]  ;;  %v807_v20 = vld [vmem:[%s1411_s3 + $0x138] sm:$0xff] }
  0x3b   :  { %190 = vst [vmem:[#allocation1 + $0x21] ss:$4 sm:$0xff] %v24_v21  ;;  %636 = vmatpush.msrb.mxu2 %v1204_v9  ;;  %604 = vmatpush.msra.mxu3 %v788_v16 }
  0x3c   :  { %191 = vst [vmem:[#allocation1 + $0x22] ss:$4 sm:$0xff] %v165_v22 }
  0x3d   :  { %192 = vst [vmem:[#allocation1 + $0x23] ss:$4 sm:$0xff] %v166_v23  ;;  %637 = vmatpush.msrb.mxu2 %v1216_v12  ;;  %605 = vmatpush.msra.mxu3 %v787_v19  ;;  %v1252_v23 = vld [vmem:[%s1411_s3 + $0x8] sm:$0xff]  ;;  %v469_v19 = vlaneseq }
  0x3e   :  { %222 = vmatmul.f32.gmra.mxu1 %v184_v24  ;;  %v786_v24 = vld [vmem:[%s1411_s3 + $0xb0] sm:$0xff] }
  0x3f   :  { %638 = vmatpush.msrb.mxu2 %v1228_v15  ;;  %606 = vmatpush.msra.mxu3 %v786_v24 }
  0x40   :  { %v193_v28 = vld.sshfl [vmem:[#allocation1] sm:$0xff pattern:$0x73625140] }
  0x41   :  { %195 = vst [vmem:[#allocation1] ss:$4 sm:$0xff] %v167_v25  ;;  %639 = vmatpush.msrb.mxu2 %v1240_v18  ;;  %v806_v25 = vld [vmem:[%s1411_s3 + $0x130] sm:$0xff] }
  0x42   :  { %196 = vst [vmem:[#allocation1 + $0x1] ss:$4 sm:$0xff] %v25_v26  ;;  %146 = vmatmul.f32.gmra.mxu0 %v1038_v5  ;;  %v812_v5 = vld [vmem:[%s1411_s3 + $0x160] sm:$0xff] }
  0x43   :  { %690 = vmatpush.msrb.mxu0 %v812_v5  ;;  %835 = vmatpush.msrb.mxu1 %v812_v5  ;;  %v1264_v26 = vld [vmem:[%s1411_s3] sm:$0xff] }
  0x44   :  { %v194_v32 = vld.sshfl [vmem:[#allocation1 + $0x20] sm:$0xff pattern:$0x73625140]  ;;  %640 = vmatpush.msrb.mxu2 %v1252_v23 }
  0x45   :  { %315 = vst [vmem:[#allocation1 + $0x20] ss:$4 sm:$0xff] %v1069_v27  ;;  %691 = vmatpush.msrb.mxu0 %v811_v8  ;;  %836 = vmatpush.msrb.mxu1 %v811_v8 }
  0x46   :  { %317 = vst [vmem:[#allocation1 + $0x21] ss:$4 sm:$0xff] %v298_v29  ;;  %225 = vmatmul.f32.gmra.mxu1 %v193_v28  ;;  %641 = vmatpush.msrb.mxu2 %v1264_v26  ;;  %v785_v28 = vld [vmem:[%s1411_s3 + $0xa8] sm:$0xff] }
  0x47   :  { %319 = vst [vmem:[#allocation1 + $0x22] ss:$4 sm:$0xff] %v299_v30  ;;  %692 = vmatpush.msrb.mxu0 %v810_v11  ;;  %837 = vmatpush.msrb.mxu1 %v810_v11  ;;  %v805_v29 = vld [vmem:[%s1411_s3 + $0x128] sm:$0xff]  ;;  %v784_v30 = vld [vmem:[%s1411_s3 + $0xa0] sm:$0xff] }
  0x48   :  { %321 = vst [vmem:[#allocation1 + $0x23] ss:$4 sm:$0xff] %v300_v33  ;;  %607 = vmatpush.msra.mxu3 %v785_v28  ;;  %v783_v33 = vld [vmem:[%s1411_s3 + $0x98] sm:$0xff] }
  0x49   :  { %v197_v36 = vld.sshfl [vmem:[#allocation1] sm:$0xff pattern:$0x73625140]  ;;  %693 = vmatpush.msrb.mxu0 %v809_v14  ;;  %838 = vmatpush.msrb.mxu1 %v809_v14 }
  0x4a   :  { %307 = vst [vmem:[#allocation1] ss:$4 sm:$0xff] %v1076_v31  ;;  %608 = vmatpush.msra.mxu3 %v784_v30 }
  0x4b   :  { %309 = vst [vmem:[#allocation1 + $0x1] ss:$4 sm:$0xff] %v295_v34  ;;  %694 = vmatpush.msrb.mxu0 %v808_v17  ;;  %839 = vmatpush.msrb.mxu1 %v808_v17  ;;  %v803_v34 = vld [vmem:[%s1411_s3 + $0x118] sm:$0xff] }
  0x4c   :  { %311 = vst [vmem:[#allocation1 + $0x2] ss:$4 sm:$0xff] %v296_v35  ;;  %v782_v35 = vld [vmem:[%s1411_s3 + $0x90] sm:$0xff]  ;;  %609 = vmatpush.msra.mxu3 %v783_v33 }
  0x4d   :  { %313 = vst [vmem:[#allocation1 + $0x3] ss:$4 sm:$0xff] %v297_v37  ;;  %695 = vmatpush.msrb.mxu0 %v807_v20  ;;  %840 = vmatpush.msrb.mxu1 %v807_v20 }
  0x4e   :  { %228 = vmatmul.f32.gmra.mxu1 %v194_v32  ;;  %v804_v32 = vld [vmem:[%s1411_s3 + $0x120] sm:$0xff]  ;;  %610 = vmatpush.msra.mxu3 %v782_v35 }
  0x4f   :  { %v323_v42 = vld.sshfl [vmem:[#allocation1 + $0x20] sm:$0xff pattern:$0x73625140]  ;;  %696 = vmatpush.msrb.mxu0 %v806_v25  ;;  %841 = vmatpush.msrb.mxu1 %v806_v25 }
  0x50   :  { %328 = vst [vmem:[#allocation1 + $0x20] ss:$4 sm:$0xff] %v303_v40 }
  0x51   :  { %329 = vst [vmem:[#allocation1 + $0x21] ss:$4 sm:$0xff] %v1093_v39  ;;  %697 = vmatpush.msrb.mxu0 %v805_v29  ;;  %842 = vmatpush.msrb.mxu1 %v805_v29 }
  0x52   :  { %330 = vst [vmem:[#allocation1 + $0x22] ss:$4 sm:$0xff] %v304_v41 }
  0x53   :  { %331 = vst [vmem:[#allocation1 + $0x23] ss:$4 sm:$0xff] %v305_v43  ;;  %698 = vmatpush.msrb.mxu0 %v804_v32  ;;  %843 = vmatpush.msrb.mxu1 %v804_v32  ;;  %v801_v43 = vld [vmem:[%s1411_s3 + $0x108] sm:$0xff]  ;;  %v1327_v32 = vshrl.u32 %v469_v19, 7 }
  0x54   :  { %v322_v46 = vld.sshfl [vmem:[#allocation1] sm:$0xff pattern:$0x73625140] }
  0x55   :  { %358 = vmatmul.f32.vlgmr.msra.gmra.mxu2 %v322_v46  ;;  %324 = vst [vmem:[#allocation1] ss:$4 sm:$0xff] %v268_v44  ;;  %699 = vmatpush.msrb.mxu0 %v803_v34  ;;  %v1300_v44 = vld [vmem:[%s1410_s2] ss:$0 sm:$0xff]  ;;  %vm473_vm0 = vcmp.eq.s32.totalorder %v1327_v32, 0 }
  0x56   :  { %325 = vst [vmem:[#allocation1 + $0x1] ss:$4 sm:$0xff] %v1088_v38  ;;  %231 = vmatmul.f32.gmra.mxu1 %v197_v36  ;;  %v802_v36 = vld [vmem:[%s1411_s3 + $0x110] sm:$0xff]  ;;  %v800_v46 = vld [vmem:[%s1411_s3 + $0x100] sm:$0xff]  ;;  %vm1339_vm1 = vmneg %vm473_vm0 }
  0x57   :  { %326 = vst [vmem:[#allocation1 + $0x2] ss:$4 sm:$0xff] %v301_v45  ;;  %844 = vmatpush.msrb.mxu1 %v803_v34  ;;  %700 = vmatpush.msrb.mxu0 %v802_v36  ;;  %v780_v45 = vld [vmem:[%s1411_s3 + $0x80] sm:$0xff] }
  0x58   :  { %327 = vst [vmem:[#allocation1 + $0x3] ss:$4 sm:$0xff] %v302_v47 }
  0x59   :  { %845 = vmatpush.msrb.mxu1 %v802_v36  ;;  %701 = vmatpush.msrb.mxu0 %v801_v43 }
  0x5a   :  { %v333_v59 = vld.sshfl [vmem:[#allocation1 + $0x20] sm:$0xff pattern:$0x73625140] }
  0x5b   :  { %846 = vmatpush.msrb.mxu1 %v801_v43  ;;  %702 = vmatpush.msrb.mxu0 %v800_v46 }
  0x5d   :  { %361 = vmatmul.f32.gmra.mxu2 %v323_v42  ;;  %v781_v42 = vld [vmem:[%s1411_s3 + $0x88] sm:$0xff]  ;;  %847 = vmatpush.msrb.mxu1 %v800_v46 }
  0x5e   :  { %611 = vmatpush.msra.mxu3 %v781_v42 }
  0x5f   :  { %v332_v58 = vld.sshfl [vmem:[#allocation1] sm:$0xff pattern:$0x73625140] }
  0x60   :  { %334 = vst [vmem:[#allocation1] ss:$4 sm:$0xff] %v306_v55  ;;  %612 = vmatpush.msra.mxu3 %v780_v45 }
  0x61   :  { %335 = vst [vmem:[#allocation1 + $0x1] ss:$4 sm:$0xff] %v271_v57  ;;  %v1310_v57 = vrot.slane %v1300_v44, 2 }
  0x62   :  { %816 = vmatpush.msrb.mxu3 %v1108_v48 }
  0x64   :  { %817 = vmatpush.msrb.mxu3 %v1113_v49 }
  0x65   :  { %364 = vmatmul.f32.gmra.mxu2 %v332_v58  ;;  %v1313_v58 = vrot.slane %v1300_v44, 4 }
  0x66   :  { %818 = vmatpush.msrb.mxu3 %v1120_v50 }
  0x68   :  { %v336_v60 = vld.sshfl [vmem:[#allocation1] sm:$0xff pattern:$0x73625140]  ;;  %819 = vmatpush.msrb.mxu3 %v1133_v53 }
  0x6a   :  { %820 = vmatpush.msrb.mxu3 %v1139_v54 }
  0x6c   :  { %821 = vmatpush.msrb.mxu3 %v1146_v56 }
  0x6d   :  { %367 = vmatmul.f32.gmra.mxu2 %v333_v59  ;;  %v1316_v59 = vrot.slane %v1300_v44, 6 }
  0x6e   :  { %822 = vmatpush.msrb.mxu3 %v1156_v61 }
  0x70   :  { %823 = vmatpush.msrb.mxu3 %v1168_v0 }
  0x72   :  { %824 = vmatpush.msrb.mxu3 %v1180_v3 }
  0x74   :  { %825 = vmatpush.msrb.mxu3 %v1192_v6  ;;  %v1352_v6 = vadd.s32 16, %v1327_v32 }
  0x75   :  { %370 = vmatmul.f32.gmra.mxu2 %v336_v60 }
  0x76   :  { %826 = vmatpush.msrb.mxu3 %v1204_v9  ;;  %vm478_vm4 = vcmp.eq.s32.totalorder %v1352_v6, 17  ;;  %v849_v6 = vld [vmem:[%s1412_s4] ss:$0 sm:$0xff] }
  0x78   :  { %827 = vmatpush.msrb.mxu3 %v1216_v12 }
  0x7a   :  { %828 = vmatpush.msrb.mxu3 %v1228_v15 }
  0x7c   :  { %829 = vmatpush.msrb.mxu3 %v1240_v18 }
  0x7e   :  { %830 = vmatpush.msrb.mxu3 %v1252_v23 }
  0x80   :  { %831 = vmatpush.msrb.mxu3 %v1264_v26 }
  0x9f   :  { %v135_v21 = vpop.f32.mrf.mxu0 }
  0xa7   :  { %v138_v37 = vpop.f32.mrf.mxu0 }
  0xaf   :  { %v141_v8 = vpop.f32.mrf.mxu0 }
  0xb3   :  { %v220_v22 = vpop.f32.mrf.mxu1 }
  0xb4   :  { %v221_v41 = vadd.f32 %v220_v22, %v135_v21 }
  0xb6   :  { %v240_v47 = vrot.slane %v221_v41, 2  ;;  %v241_v51 = vrot.slane %v221_v41, 4  ;;  %v242_v52 = vrot.slane %v221_v41, 6 }
  0xb7   :  { %v144_v56 = vpop.f32.mrf.mxu0 }
  0xbb   :  { %v223_v40 = vpop.f32.mrf.mxu1 }
  0xbc   :  { %v224_v2 = vadd.f32 %v223_v40, %v138_v37 }
  0xbe   :  { %v243_v49 = vrot.slane %v224_v2, 2  ;;  %v244_v17 = vrot.slane %v224_v2, 4  ;;  %v245_v24 = vrot.slane %v224_v2, 6 }
  0xc3   :  { %v226_v10 = vpop.f32.mrf.mxu1 }
  0xc4   :  { %v227_v53 = vadd.f32 %v226_v10, %v141_v8 }
  0xc6   :  { %v246_v43 = vrot.slane %v227_v53, 2  ;;  %v247_v45 = vrot.slane %v227_v53, 4  ;;  %v248_v61 = vrot.slane %v227_v53, 6 }
  0xcb   :  { %v229_v42 = vpop.f32.mrf.mxu1 }
  0xd3   :  { %v232_v19 = vpop.f32.mrf.mxu1 }
  0xd8   :  { %v359_v55 = vpop.f32.mrf.mxu2 }
  0xd9   :  { %v379_v60 = vrot.slane %v359_v55, 2  ;;  %v380_v62 = vrot.slane %v359_v55, 4  ;;  %v381_v63 = vrot.slane %v359_v55, 6  ;;  %v405_v1 = vadd.f32 %v359_v55, %v221_v41 }
  0xdb   :  { %v406_v4 = vadd.f32 %v379_v60, %v240_v47  ;;  %v407_v48 = vadd.f32 %v380_v62, %v241_v51  ;;  %v408_v5 = vadd.f32 %v381_v63, %v242_v52  ;;  %v433_v7 = vadd.f32 %v1300_v44, %v405_v1 }
  0xdd   :  { %v434_v11 = vadd.f32 %v1310_v57, %v406_v4  ;;  %v435_v13 = vadd.f32 %v1313_v58, %v407_v48  ;;  %v436_v14 = vadd.f32 %v1316_v59, %v408_v5  ;;  %v451_v16 = vmax.f32 %v433_v7, 0.0 }
  0xdf   :  { %v452_v20 = vmax.f32 %v434_v11, 0.0  ;;  %v453_v21 = vmax.f32 %v435_v13, 0.0  ;;  %v454_v22 = vmax.f32 %v436_v14, 0.0  ;;  %500 = vst [vmem:[#allocation1] ss:$4 sm:$0xff] %v451_v16 }
  0xe0   :  { %v362_v50 = vpop.f32.mrf.mxu2 }
  0xe1   :  { %502 = vst [vmem:[#allocation1 + $0x1] ss:$4 sm:$0xff] %v452_v20  ;;  %v382_v25 = vrot.slane %v362_v50, 2  ;;  %v383_v28 = vrot.slane %v362_v50, 4  ;;  %v384_v29 = vrot.slane %v362_v50, 6  ;;  %v409_v30 = vadd.f32 %v362_v50, %v224_v2 }
  0xe2   :  { %504 = vst [vmem:[#allocation1 + $0x2] ss:$4 sm:$0xff] %v453_v21  ;;  %v230_v2 = vadd.f32 %v229_v42, %v144_v56 }
  0xe3   :  { %506 = vst [vmem:[#allocation1 + $0x3] ss:$4 sm:$0xff] %v454_v22  ;;  %v410_v33 = vadd.f32 %v382_v25, %v243_v49  ;;  %v411_v34 = vadd.f32 %v383_v28, %v244_v17  ;;  %v412_v35 = vadd.f32 %v384_v29, %v245_v24  ;;  %v437_v36 = vadd.f32 %v1300_v44, %v409_v30  ;;  %v147_v17 = vpop.f32.mrf.mxu0 }
  0xe4   :  { %v249_v14 = vrot.slane %v230_v2, 2  ;;  %v250_v16 = vrot.slane %v230_v2, 4  ;;  %v251_v49 = vrot.slane %v230_v2, 6  ;;  %v233_v29 = vadd.f32 %v232_v19, %v147_v17 }
  0xe5   :  { %v438_v54 = vadd.f32 %v1310_v57, %v410_v33  ;;  %v439_v37 = vadd.f32 %v1313_v58, %v411_v34  ;;  %v440_v40 = vadd.f32 %v1316_v59, %v412_v35  ;;  %v455_v41 = vmax.f32 %v437_v36, 0.0 }
  0xe7   :  { %v456_v46 = vmax.f32 %v438_v54, 0.0  ;;  %v457_v47 = vmax.f32 %v439_v37, 0.0  ;;  %v458_v51 = vmax.f32 %v440_v40, 0.0  ;;  %508 = vst [vmem:[#allocation1 + $0x20] ss:$4 sm:$0xff] %v455_v41 }
  0xe8   :  { %v365_v52 = vpop.f32.mrf.mxu2 }
  0xe9   :  { %510 = vst [vmem:[#allocation1 + $0x21] ss:$4 sm:$0xff] %v456_v46  ;;  %v385_v55 = vrot.slane %v365_v52, 2  ;;  %v386_v60 = vrot.slane %v365_v52, 4  ;;  %v387_v62 = vrot.slane %v365_v52, 6  ;;  %v413_v63 = vadd.f32 %v365_v52, %v227_v53 }
  0xea   :  { %512 = vst [vmem:[#allocation1 + $0x22] ss:$4 sm:$0xff] %v457_v47  ;;  %v515_v0 = vld.sshfl [vmem:[#allocation1] sm:$0xff pattern:$0x73625140] }
  0xeb   :  { %514 = vst [vmem:[#allocation1 + $0x23] ss:$4 sm:$0xff] %v458_v51  ;;  %v414_v4 = vadd.f32 %v385_v55, %v246_v43  ;;  %v415_v48 = vadd.f32 %v386_v60, %v247_v45  ;;  %v416_v3 = vadd.f32 %v387_v62, %v248_v61  ;;  %v441_v5 = vadd.f32 %v1300_v44, %v413_v63 }
  0xec   :  { %797 = vmatmul.msk.f32.vlgmr.msrb.gmra.mxu2 %vm1339_vm1, %v515_v0  ;;  %v537_v22 = vsel %vm473_vm0, 0.0, %v515_v0  ;;  %v252_v43 = vrot.slane %v233_v29, 2 }
  0xed   :  { %v442_v7 = vadd.f32 %v1300_v44, %v414_v4  ;;  %v443_v8 = vadd.f32 %v1310_v57, %v415_v48  ;;  %v444_v10 = vadd.f32 %v1313_v58, %v416_v3  ;;  %v459_v11 = vmax.f32 %v441_v5, 0.0 }
  0xee   :  { %v583_v15 = vrot.slane %v537_v22, 1  ;;  %v673_v36 = vrot.slane %v537_v22, 2 }
  0xef   :  { %v460_v13 = vmax.f32 %v442_v7, 0.0  ;;  %517 = vst [vmem:[#allocation1] ss:$4 sm:$0xff] %v459_v11  ;;  %v461_v9 = vmax.f32 %v443_v8, 0.0  ;;  %v462_v20 = vmax.f32 %v444_v10, 0.0 }
  0xf0   :  { %v368_v21 = vpop.f32.mrf.mxu2 }
  0xf1   :  { %v388_v24 = vrot.slane %v368_v21, 2  ;;  %v389_v50 = vrot.slane %v368_v21, 4  ;;  %v390_v25 = vrot.slane %v368_v21, 6  ;;  %v417_v28 = vadd.f32 %v368_v21, %v230_v2 }
  0xf2   :  { %v1358_v12 = vld.sshfl [vmem:[#allocation1 + $0x20] sm:$0xff pattern:$0x73625140] }
  0xf3   :  { %v418_v30 = vadd.f32 %v388_v24, %v249_v14  ;;  %v419_v53 = vadd.f32 %v389_v50, %v250_v16  ;;  %v420_v33 = vadd.f32 %v390_v25, %v251_v49  ;;  %v445_v34 = vadd.f32 %v1316_v59, %v417_v28  ;;  %519 = vst [vmem:[#allocation1 + $0x20] ss:$4 sm:$0xff] %v460_v13 }
  0xf4   :  { %v584_v35 = vrot.slane %v1358_v12, 1  ;;  %520 = vst [vmem:[#allocation1 + $0x21] ss:$4 sm:$0xff] %v461_v9  ;;  %v674_v54 = vrot.slane %v1358_v12, 2 }
  0xf5   :  { %v446_v37 = vadd.f32 %v1300_v44, %v418_v30  ;;  %v447_v40 = vadd.f32 %v1310_v57, %v419_v53  ;;  %v448_v18 = vadd.f32 %v1313_v58, %v420_v33  ;;  %v463_v41 = vmax.f32 %v445_v34, 0.0  ;;  %521 = vst [vmem:[#allocation1 + $0x22] ss:$4 sm:$0xff] %v462_v20 }
  0xf6   :  { %v585_v56 = vsel %vm582_vm2, %v583_v15, %v584_v35  ;;  %v675_v42 = vsel %vm672_vm3, %v673_v36, %v674_v54  ;;  %v518_v45 = vld.sshfl [vmem:[#allocation1] sm:$0xff pattern:$0x73625140] }
  0xf7   :  { %v464_v46 = vmax.f32 %v446_v37, 0.0  ;;  %v465_v47 = vmax.f32 %v447_v40, 0.0  ;;  %v466_v51 = vmax.f32 %v448_v18, 0.0  ;;  %613 = vmatmul.f32.vlgmr.msra.gmra.mxu3 %v585_v56  ;;  %522 = vst [vmem:[#allocation1 + $0x23] ss:$4 sm:$0xff] %v463_v41  ;;  %703 = vmatmul.f32.vlgmr.msrb.gmra.mxu0 %v675_v42  ;;  %v539_v23 = vsel %vm478_vm4, 0.0, %v518_v45 }
  0xf8   :  { %v371_v57 = vpop.f32.mrf.mxu2  ;;  %v586_v58 = vrot.slane %v539_v23, 1  ;;  %v676_v61 = vrot.slane %v539_v23, 2 }
  0xf9   :  { %v391_v52 = vrot.slane %v371_v57, 2  ;;  %v421_v55 = vadd.f32 %v371_v57, %v233_v29  ;;  %524 = vst [vmem:[#allocation1] ss:$4 sm:$0xff] %v464_v46 }
  0xfa   :  { %525 = vst [vmem:[#allocation1 + $0x1] ss:$4 sm:$0xff] %v465_v47  ;;  %v587_v26 = vsel %vm582_vm2, %v584_v35, %v586_v58  ;;  %v677_v63 = vsel %vm672_vm3, %v674_v54, %v676_v61 }
  0xfb   :  { %v422_v60 = vadd.f32 %v391_v52, %v252_v43  ;;  %v449_v62 = vadd.f32 %v1316_v59, %v421_v55  ;;  %526 = vst [vmem:[#allocation1 + $0x2] ss:$4 sm:$0xff] %v466_v51 }
  0xfd   :  { %v450_v0 = vadd.f32 %v1300_v44, %v422_v60  ;;  %v467_v2 = vmax.f32 %v449_v62, 0.0 }
  0xfe   :  { %v523_v48 = vld.sshfl [vmem:[#allocation1 + $0x20] sm:$0xff pattern:$0x73625140] }
  0xff   :  { %v468_v4 = vmax.f32 %v450_v0, 0.0  ;;  %616 = vmatmul.f32.gmra.mxu3 %v587_v26  ;;  %527 = vst [vmem:[#allocation1 + $0x3] ss:$4 sm:$0xff] %v467_v2  ;;  %706 = vmatmul.f32.gmra.mxu0 %v677_v63  ;;  %v540_v3 = vsel %vm473_vm0, 0.0, %v523_v48 }
 0x100   :  { %v588_v7 = vrot.slane %v540_v3, 1  ;;  %v678_v8 = vrot.slane %v540_v3, 2 }
 0x101   :  { %528 = vst [vmem:[#allocation1 + $0x20] ss:$4 sm:$0xff] %v468_v4 }
 0x106   :  { %v529_v5 = vld.sshfl [vmem:[#allocation1] sm:$0xff pattern:$0x73625140] }
 0x107   :  { %v589_v59 = vrot.slane %v529_v5, 1  ;;  %v679_v10 = vrot.slane %v529_v5, 2 }
 0x108   :  { %v530_v11 = vld.sshfl [vmem:[#allocation1 + $0x20] sm:$0xff pattern:$0x73625140] }
 0x109   :  { %v590_v13 = vsel %vm582_vm2, %v588_v7, %v589_v59  ;;  %v680_v44 = vsel %vm672_vm3, %v678_v8, %v679_v10  ;;  %v542_v14 = vsel %vm478_vm4, 0.0, %v530_v11 }
 0x10a   :  { %619 = vmatmul.f32.gmra.mxu3 %v590_v13  ;;  %709 = vmatmul.f32.vlgmr.msrb.gmra.mxu1 %v680_v44  ;;  %v591_v16 = vrot.slane %v542_v14, 1  ;;  %v681_v49 = vrot.slane %v542_v14, 2 }
 0x10c   :  { %v592_v32 = vsel %vm582_vm2, %v589_v59, %v591_v16  ;;  %v682_v17 = vsel %vm672_vm3, %v679_v10, %v681_v49 }
 0x112   :  { %622 = vmatmul.f32.gmra.mxu3 %v592_v32  ;;  %712 = vmatmul.f32.gmra.mxu1 %v682_v17 }
 0x11a   :  { %645 = vmatmul.f32.vlgmr.msrb.gmra.mxu3 %v1358_v12 }
 0x122   :  { %799 = vmatmul.msk.f32.gmra.mxu3 %vm1339_vm1, %v523_v48 }
 0x12a   :  { %651 = vmatmul.f32.gmra.mxu3 %v529_v5 }
 0x16f   :  { %v643_v19 = vpop.f32.mrf.mxu2 }
 0x174   :  { %v704_v21 = vpop.f32.mrf.mxu0 }
 0x17a   :  { %v614_v9 = vpop.f32.mrf.mxu3 }
 0x17b   :  { %v644_v20 = vadd.f32 %v643_v19, %v614_v9 }
 0x17c   :  { %v707_v53 = vpop.f32.mrf.mxu0 }
 0x17d   :  { %v716_v22 = vadd.f32 %v704_v21, %v644_v20 }
 0x17f   :  { %v728_v24 = vadd.f32 %v849_v6, %v716_v22 }
 0x181   :  { %v732_v50 = vadd.f32 %v728_v24, %v1076_v31 }
 0x182   :  { %v617_v1 = vpop.f32.mrf.mxu3 }
 0x183   :  { %v736_v25 = vmax.f32 %v732_v50, 0.0 }
 0x185   :  { %740 = vst [vmem:[%s1413_s5] sm:$0xff] %v736_v25 }
 0x187   :  { %v710_v35 = vpop.f32.mrf.mxu1 }
 0x18d   :  { %v620_v28 = vpop.f32.mrf.mxu3 }
 0x18f   :  { %v713_v43 = vpop.f32.mrf.mxu1 }
 0x195   :  { %v623_v12 = vpop.f32.mrf.mxu3 }
 0x19d   :  { %v646_v29 = vpop.f32.mrf.mxu3 }
 0x19e   :  { %v647_v30 = vadd.f32 %v646_v29, %v617_v1 }
 0x1a0   :  { %v717_v33 = vadd.f32 %v707_v53, %v647_v30 }
 0x1a2   :  { %v729_v34 = vadd.f32 %v849_v6, %v717_v33 }
 0x1a4   :  { %v733_v15 = vadd.f32 %v729_v34, %v1069_v27 }
 0x1a5   :  { %v649_v36 = vpop.f32.mrf.mxu3 }
 0x1a6   :  { %v737_v54 = vmax.f32 %v733_v15, 0.0  ;;  %v650_v37 = vadd.f32 %v649_v36, %v620_v28 }
 0x1a8   :  { %741 = vst [vmem:[%s1413_s5 + $0x8] sm:$0xff] %v737_v54  ;;  %v718_v31 = vadd.f32 %v710_v35, %v650_v37 }
 0x1aa   :  { %v730_v40 = vadd.f32 %v849_v6, %v718_v31 }
 0x1ac   :  { %v734_v18 = vadd.f32 %v730_v40, %v1088_v38 }
 0x1ad   :  { %v652_v41 = vpop.f32.mrf.mxu3 }
 0x1ae   :  { %v738_v56 = vmax.f32 %v734_v18, 0.0  ;;  %v653_v42 = vadd.f32 %v652_v41, %v623_v12 }
 0x1b0   :  { %742 = vst [vmem:[%s1413_s5 + $0x10] sm:$0xff] %v738_v56  ;;  %v719_v27 = vadd.f32 %v713_v43, %v653_v42 }
 0x1b2   :  { %v731_v45 = vadd.f32 %v849_v6, %v719_v27 }
 0x1b4   :  { %v735_v46 = vadd.f32 %v731_v45, %v1093_v39 }
 0x1b6   :  { %v739_v47 = vmax.f32 %v735_v46, 0.0 }
 0x1b8   :  { %743 = vst [vmem:[%s1413_s5 + $0x18] sm:$0xff] %v739_v47 }

</bundles_post_ra>
